<compile_context>
chip_gen: v7x
topology: tpu7x:2x2x1
jax: 0.10.0
libtpu: 0.0.40
codegen_flags: <defaults>
</compile_context>

<pallas_src>
import functools

import jax
import jax.numpy as jnp
from jax.experimental import pallas as pl
from jax.experimental.pallas import tpu as pltpu

BACKBONE_OUT = 1000       # torch.hub ImageNet head size
_BACKBONE_PAD = 1024      # lane-dense padding of the 1000-wide backbone output
_LANE = 128


def _round_up(n, m):
    return ((n + m - 1) // m) * m


def _fused_kernel(x_ref, wb_ref, bb_ref, wf_ref, bf_ref, wc_ref, bc_ref,
                  feat_ref, logits_ref, acc_ref, *, inv_hw):
    """Grid = (batch_tiles, spatial_tiles); spatial axis is the reduction."""
    s = pl.program_id(1)

    @pl.when(s == 0)
    def _init():
        acc_ref[...] = jnp.zeros_like(acc_ref)

    # Partial spatial sum: x streamed from HBM as bf16, accumulated in f32
    # (v5e has no bf16 VPU path, so cast before the reduce).
    acc_ref[...] += jnp.sum(x_ref[...].astype(jnp.float32), axis=-1)   # (B_t, C)

    @pl.when(s == pl.num_programs(1) - 1)
    def _finalize():
        pooled = acc_ref[...] * inv_hw                                  # (B_t, C)
        # synthetic backbone: global-avg-pool + Linear(C -> 1000 [padded 1024])
        backbone = jnp.dot(pooled, wb_ref[...],
                           preferred_element_type=jnp.float32) + bb_ref[...]
        # feature = nn.Linear(1000, feature_dim)
        feat = jnp.dot(backbone, wf_ref[...],
                       preferred_element_type=jnp.float32) + bf_ref[...]
        # cls = nn.Linear(feature_dim, num_classes)   (loss_type != 'ArcLoss')
        logits = jnp.dot(feat, wc_ref[...],
                         preferred_element_type=jnp.float32) + bc_ref[...]
        feat_ref[...] = feat
        logits_ref[...] = logits


def image_classifier_forward(x_nchw, params):
    """x_nchw: (B, C, H, W). Returns (features (B,F), logits (B,K)) in f32."""
    B, C, H, W = x_nchw.shape
    wb, bb, wf, bf, wc, bc = params
    F = wf.shape[1]
    K = wc.shape[1]

    HW = H * W
    F_pad = _round_up(F, _LANE)
    K_pad = _round_up(K, _LANE)

    # ---- tiling -------------------------------------------------------------
    # Spatial tile: lane-dense, big enough to keep the DMA pipeline near HBM
    # roofline, small enough for double-buffering under every chip's VMEM.
    S_t = min(2048, _round_up(HW, _LANE))
    HW_pad = _round_up(HW, S_t)
    # Batch tile: whole batch if small, else 128-row tiles (full MXU M dim).
    B_t = B if B <= 128 else 128
    B_pad = _round_up(B, B_t)

    # ---- lane-dense zero padding (pure layout plumbing) ----------------------
    # x -> (B, C, HW) bf16; zero-pad batch/spatial (zeros don't bias the sum).
    x = x_nchw.reshape(B, C, HW).astype(jnp.bfloat16)
    x = jnp.pad(x, ((0, B_pad - B), (0, 0), (0, HW_pad - HW)))

    f32 = jnp.float32
    wb_p = jnp.pad(wb.astype(f32), ((0, 0), (0, _BACKBONE_PAD - BACKBONE_OUT)))
    bb_p = jnp.pad(bb.astype(f32), ((0, 0), (0, _BACKBONE_PAD - BACKBONE_OUT)))
    wf_p = jnp.pad(wf.astype(f32), ((0, _BACKBONE_PAD - BACKBONE_OUT), (0, F_pad - F)))
    bf_p = jnp.pad(bf.astype(f32), ((0, 0), (0, F_pad - F)))
    wc_p = jnp.pad(wc.astype(f32), ((0, F_pad - F), (0, K_pad - K)))
    bc_p = jnp.pad(bc.astype(f32), ((0, 0), (0, K_pad - K)))

    grid = (B_pad // B_t, HW_pad // S_t)
    kernel = functools.partial(_fused_kernel, inv_hw=1.0 / HW)

    def resident(block):  # weights/biases: DMA'd once, stay in VMEM
        return pl.BlockSpec(block, lambda b, s: (0,) * len(block))

    feat_p, logits_p = pl.pallas_call(
        kernel,
        out_shape=(jax.ShapeDtypeStruct((B_pad, F_pad), jnp.float32),
                   jax.ShapeDtypeStruct((B_pad, K_pad), jnp.float32)),
        grid_spec=pltpu.PrefetchScalarGridSpec(
            num_scalar_prefetch=0,
            grid=grid,
            in_specs=[
                pl.BlockSpec((B_t, C, S_t), lambda b, s: (b, 0, s)),  # streamed x
                resident((C, _BACKBONE_PAD)),
                resident((1, _BACKBONE_PAD)),
                resident((_BACKBONE_PAD, F_pad)),
                resident((1, F_pad)),
                resident((F_pad, K_pad)),
                resident((1, K_pad)),
            ],
            out_specs=(pl.BlockSpec((B_t, F_pad), lambda b, s: (b, 0)),
                       pl.BlockSpec((B_t, K_pad), lambda b, s: (b, 0))),
            scratch_shapes=[pltpu.VMEM((B_t, C), jnp.float32)],
        ),
        compiler_params=pltpu.CompilerParams(
            dimension_semantics=("parallel", "arbitrary"),
            vmem_limit_bytes=32 * 1024 * 1024,
        ),
    )(x, wb_p, bb_p, wf_p, bf_p, wc_p, bc_p)

    return feat_p[:B, :F], logits_p[:B, :K]


def init_params(key, in_channels, feature_dim, num_classes):
    k = jax.random.split(key, 6)
    scale = 0.02
    wb = scale * jax.random.normal(k[0], (in_channels, BACKBONE_OUT), jnp.float32)
    bb = scale * jax.random.normal(k[1], (1, BACKBONE_OUT), jnp.float32)
    wf = scale * jax.random.normal(k[2], (BACKBONE_OUT, feature_dim), jnp.float32)
    bf = scale * jax.random.normal(k[3], (1, feature_dim), jnp.float32)
    wc = scale * jax.random.normal(k[4], (feature_dim, num_classes), jnp.float32)
    bc = scale * jax.random.normal(k[5], (1, num_classes), jnp.float32)
    return (wb, bb, wf, bf, wc, bc)


def _reference(x_nchw, params):
    wb, bb, wf, bf, wc, bc = params
    B, C, H, W = x_nchw.shape
    # Match the kernel's input precision (x is streamed as bf16); everything
    # downstream stays f32.
    xq = x_nchw.reshape(B, C, H * W).astype(jnp.bfloat16).astype(jnp.float32)
    pooled = xq.mean(-1)
    hi = jax.lax.Precision.HIGHEST
    backbone = jnp.dot(pooled, wb, precision=hi) + bb
    feat = jnp.dot(backbone, wf, precision=hi) + bf
    logits = jnp.dot(feat, wc, precision=hi) + bc
    return feat, logits


if __name__ == "__main__":
    key = jax.random.PRNGKey(0)
    kx, kp = jax.random.split(key)

    B, C, H, W = 2, 4, 16, 16
    feature_dim, num_classes = 32, 8

    x = jax.random.normal(kx, (B, C, H, W), jnp.float32)     # NCHW, like PyTorch
    params = init_params(kp, C, feature_dim, num_classes)

    feat, logits = image_classifier_forward(x, params)
    jax.block_until_ready((feat, logits))

    ref_feat, ref_logits = _reference(x, params)
    assert feat.shape == (B, feature_dim) and logits.shape == (B, num_classes)
    assert jnp.allclose(feat, ref_feat, atol=1e-3, rtol=1e-3)
    assert jnp.allclose(logits, ref_logits, atol=1e-3, rtol=1e-3)

    print("KERNEL_OK")
</pallas_src>

<mosaic_0001>
module attributes {stable_mosaic.version = 11 : i64} {
  func.func @_fused_kernel(%arg0: i32, %arg1: i32, %arg2: memref<2x4x256xbf16, #tpu.memory_space<vmem>>, %arg3: memref<4x1024xf32, #tpu.memory_space<vmem>>, %arg4: memref<1x1024xf32, #tpu.memory_space<vmem>>, %arg5: memref<1024x128xf32, #tpu.memory_space<vmem>>, %arg6: memref<1x128xf32, #tpu.memory_space<vmem>>, %arg7: memref<128x128xf32, #tpu.memory_space<vmem>>, %arg8: memref<1x128xf32, #tpu.memory_space<vmem>>, %arg9: memref<2x128xf32, #tpu.memory_space<vmem>>, %arg10: memref<2x128xf32, #tpu.memory_space<vmem>>, %arg11: memref<2x4xf32, #tpu.memory_space<vmem>>) attributes {dimension_semantics = [#tpu.dimension_semantics<parallel>, #tpu.dimension_semantics<arbitrary>], iteration_bounds = array<i64: 1, 1>, scalar_prefetch = 0 : i64, scratch_operands = 1 : i64, tpu.core_type = #tpu.core_type<tc>, window_params = [{transform_indices = @transform_0, window_bounds = array<i64: 2, 4, 256>}, {pipeline_mode = #tpu.pipeline_mode<synchronous>, transform_indices = @transform_1, window_bounds = array<i64: 4, 1024>}, {pipeline_mode = #tpu.pipeline_mode<synchronous>, transform_indices = @transform_2, window_bounds = array<i64: 1, 1024>}, {pipeline_mode = #tpu.pipeline_mode<synchronous>, transform_indices = @transform_3, window_bounds = array<i64: 1024, 128>}, {pipeline_mode = #tpu.pipeline_mode<synchronous>, transform_indices = @transform_4, window_bounds = array<i64: 1, 128>}, {pipeline_mode = #tpu.pipeline_mode<synchronous>, transform_indices = @transform_5, window_bounds = array<i64: 128, 128>}, {pipeline_mode = #tpu.pipeline_mode<synchronous>, transform_indices = @transform_6, window_bounds = array<i64: 1, 128>}, {transform_indices = @transform_7, window_bounds = array<i64: 2, 128>}, {transform_indices = @transform_8, window_bounds = array<i64: 2, 128>}]} {
    %c0_i32 = arith.constant 0 : i32
    %0 = arith.cmpi eq, %arg1, %c0_i32 : i32
    %1 = arith.extui %0 : i1 to i32
    %c0_i32_0 = arith.constant 0 : i32
    %2 = arith.cmpi ne, %1, %c0_i32_0 : i32
    scf.if %2 {
      %cst_9 = arith.constant 0.000000e+00 : f32
      %12 = vector.broadcast %cst_9 : f32 to vector<2x4xf32>
      %c0_10 = arith.constant 0 : index
      %c0_11 = arith.constant 0 : index
      %13 = vector.load %arg11[%c0_10, %c0_11] : memref<2x4xf32, #tpu.memory_space<vmem>>, vector<2x4xf32>
      tpu.vector_store %arg11[%c0_10, %c0_11], %12 {strides = array<i32>} : memref<2x4xf32, #tpu.memory_space<vmem>>, vector<2x4xf32>,
    } else {
    }
    %c0 = arith.constant 0 : index
    %c0_1 = arith.constant 0 : index
    %3 = vector.load %arg11[%c0, %c0_1] : memref<2x4xf32, #tpu.memory_space<vmem>>, vector<2x4xf32>
    %c0_2 = arith.constant 0 : index
    %c0_3 = arith.constant 0 : index
    %c0_4 = arith.constant 0 : index
    %4 = vector.load %arg2[%c0_2, %c0_3, %c0_4] : memref<2x4x256xbf16, #tpu.memory_space<vmem>>, vector<2x4x256xbf16>
    %5 = arith.extf %4 : vector<2x4x256xbf16> to vector<2x4x256xf32>
    %cst = arith.constant dense<0.000000e+00> : vector<2x4xf32>
    %6 = vector.multi_reduction <add>, %5, %cst [2] : vector<2x4x256xf32> to vector<2x4xf32>
    %7 = arith.addf %3, %6 : vector<2x4xf32>
    %c0_5 = arith.constant 0 : index
    %c0_6 = arith.constant 0 : index
    %8 = vector.load %arg11[%c0_5, %c0_6] : memref<2x4xf32, #tpu.memory_space<vmem>>, vector<2x4xf32>
    tpu.vector_store %arg11[%c0_5, %c0_6], %7 {strides = array<i32>} : memref<2x4xf32, #tpu.memory_space<vmem>>, vector<2x4xf32>,
    %c0_i32_7 = arith.constant 0 : i32
    %9 = arith.cmpi eq, %arg1, %c0_i32_7 : i32
    %10 = arith.extui %9 : i1 to i32
    %c0_i32_8 = arith.constant 0 : i32
    %11 = arith.cmpi ne, %10, %c0_i32_8 : i32
    scf.if %11 {
      %c0_9 = arith.constant 0 : index
      %c0_10 = arith.constant 0 : index
      %12 = vector.load %arg11[%c0_9, %c0_10] : memref<2x4xf32, #tpu.memory_space<vmem>>, vector<2x4xf32>
      %cst_11 = arith.constant 3.906250e-03 : f32
      %13 = vector.broadcast %cst_11 : f32 to vector<2x4xf32>
      %14 = arith.mulf %12, %13 : vector<2x4xf32>
      %c0_12 = arith.constant 0 : index
      %c0_13 = arith.constant 0 : index
      %15 = vector.load %arg3[%c0_12, %c0_13] : memref<4x1024xf32, #tpu.memory_space<vmem>>, vector<4x1024xf32>
      %cst_14 = arith.constant dense<0.000000e+00> : vector<2x1024xf32>
      %16 = tpu.matmul %14, %15, %cst_14 {dimension_numbers = #tpu.dot_dimension_numbers<[1], [0], [0], [1], [0, 0, 1, 1], [], []>} : vector<2x4xf32>, vector<4x1024xf32>, vector<2x1024xf32> -> vector<2x1024xf32>
      %c0_15 = arith.constant 0 : index
      %c0_16 = arith.constant 0 : index
      %17 = vector.load %arg4[%c0_15, %c0_16] : memref<1x1024xf32, #tpu.memory_space<vmem>>, vector<1x1024xf32>
      %18 = vector.broadcast %17 : vector<1x1024xf32> to vector<2x1024xf32>
      %19 = arith.addf %16, %18 : vector<2x1024xf32>
      %c0_17 = arith.constant 0 : index
      %c0_18 = arith.constant 0 : index
      %20 = vector.load %arg5[%c0_17, %c0_18] : memref<1024x128xf32, #tpu.memory_space<vmem>>, vector<1024x128xf32>
      %cst_19 = arith.constant dense<0.000000e+00> : vector<2x128xf32>
      %21 = tpu.matmul %19, %20, %cst_19 {dimension_numbers = #tpu.dot_dimension_numbers<[1], [0], [0], [1], [0, 0, 1, 1], [], []>} : vector<2x1024xf32>, vector<1024x128xf32>, vector<2x128xf32> -> vector<2x128xf32>
      %c0_20 = arith.constant 0 : index
      %c0_21 = arith.constant 0 : index
      %22 = vector.load %arg6[%c0_20, %c0_21] : memref<1x128xf32, #tpu.memory_space<vmem>>, vector<1x128xf32>
      %23 = vector.broadcast %22 : vector<1x128xf32> to vector<2x128xf32>
      %24 = arith.addf %21, %23 : vector<2x128xf32>
      %c0_22 = arith.constant 0 : index
      %c0_23 = arith.constant 0 : index
      %25 = vector.load %arg7[%c0_22, %c0_23] : memref<128x128xf32, #tpu.memory_space<vmem>>, vector<128x128xf32>
      %cst_24 = arith.constant dense<0.000000e+00> : vector<2x128xf32>
      %26 = tpu.matmul %24, %25, %cst_24 {dimension_numbers = #tpu.dot_dimension_numbers<[1], [0], [0], [1], [0, 0, 1, 1], [], []>} : vector<2x128xf32>, vector<128x128xf32>, vector<2x128xf32> -> vector<2x128xf32>
      %c0_25 = arith.constant 0 : index
      %c0_26 = arith.constant 0 : index
      %27 = vector.load %arg8[%c0_25, %c0_26] : memref<1x128xf32, #tpu.memory_space<vmem>>, vector<1x128xf32>
      %28 = vector.broadcast %27 : vector<1x128xf32> to vector<2x128xf32>
      %29 = arith.addf %26, %28 : vector<2x128xf32>
      %c0_27 = arith.constant 0 : index
      %c0_28 = arith.constant 0 : index
      %30 = vector.load %arg9[%c0_27, %c0_28] : memref<2x128xf32, #tpu.memory_space<vmem>>, vector<2x128xf32>
      tpu.vector_store %arg9[%c0_27, %c0_28], %24 {strides = array<i32>} : memref<2x128xf32, #tpu.memory_space<vmem>>, vector<2x128xf32>,
      %c0_29 = arith.constant 0 : index
      %c0_30 = arith.constant 0 : index
      %31 = vector.load %arg10[%c0_29, %c0_30] : memref<2x128xf32, #tpu.memory_space<vmem>>, vector<2x128xf32>
      tpu.vector_store %arg10[%c0_29, %c0_30], %29 {strides = array<i32>} : memref<2x128xf32, #tpu.memory_space<vmem>>, vector<2x128xf32>,
    } else {
    }
    return
  }
  func.func @transform_0(%arg0: i32, %arg1: i32) -> (i32, i32, i32) {
    %c0_i32 = arith.constant 0 : i32
    %c0_i32_0 = arith.constant 0 : i32
    return %arg0, %c0_i32, %arg1 : i32, i32, i32
  }
  func.func @transform_1(%arg0: i32, %arg1: i32) -> (i32, i32) {
    %c0_i32 = arith.constant 0 : i32
    %c0_i32_0 = arith.constant 0 : i32
    %c0_i32_1 = arith.constant 0 : i32
    return %c0_i32, %c0_i32_0 : i32, i32
  }
  func.func @transform_2(%arg0: i32, %arg1: i32) -> (i32, i32) {
    %c0_i32 = arith.constant 0 : i32
    %c0_i32_0 = arith.constant 0 : i32
    %c0_i32_1 = arith.constant 0 : i32
    return %c0_i32, %c0_i32_0 : i32, i32
  }
  func.func @transform_3(%arg0: i32, %arg1: i32) -> (i32, i32) {
    %c0_i32 = arith.constant 0 : i32
    %c0_i32_0 = arith.constant 0 : i32
    %c0_i32_1 = arith.constant 0 : i32
    return %c0_i32, %c0_i32_0 : i32, i32
  }
  func.func @transform_4(%arg0: i32, %arg1: i32) -> (i32, i32) {
    %c0_i32 = arith.constant 0 : i32
    %c0_i32_0 = arith.constant 0 : i32
    %c0_i32_1 = arith.constant 0 : i32
    return %c0_i32, %c0_i32_0 : i32, i32
  }
  func.func @transform_5(%arg0: i32, %arg1: i32) -> (i32, i32) {
    %c0_i32 = arith.constant 0 : i32
    %c0_i32_0 = arith.constant 0 : i32
    %c0_i32_1 = arith.constant 0 : i32
    return %c0_i32, %c0_i32_0 : i32, i32
  }
  func.func @transform_6(%arg0: i32, %arg1: i32) -> (i32, i32) {
    %c0_i32 = arith.constant 0 : i32
    %c0_i32_0 = arith.constant 0 : i32
    %c0_i32_1 = arith.constant 0 : i32
    return %c0_i32, %c0_i32_0 : i32, i32
  }
  func.func @transform_7(%arg0: i32, %arg1: i32) -> (i32, i32) {
    %c0_i32 = arith.constant 0 : i32
    %c0_i32_0 = arith.constant 0 : i32
    return %arg0, %c0_i32 : i32, i32
  }
  func.func @transform_8(%arg0: i32, %arg1: i32) -> (i32, i32) {
    %c0_i32 = arith.constant 0 : i32
    %c0_i32_0 = arith.constant 0 : i32
    return %arg0, %c0_i32 : i32, i32
  }
}

</mosaic_0001>

<bundles_post_ra>
// kernel: tpu_custom_call.1
= control target key start
LH: loop header
LB: loop body
LE: loop exit
PB: predicated region body
PF: predicated region fallthrough
CT: control target
= control target key end

     0   :  { %14 = vsyncpa [#allocation4], 0  ;;  %s1806_s0 = inlined_call_operand.hbm [shape: bf16[2,4,256], index: 0, kind: input, shape index: {}]   ;;  %s1807_s1 = inlined_call_operand.hbm [shape: f32[4,1024], index: 1, kind: input, shape index: {}]   ;;  %s1808_s2 = inlined_call_operand.hbm [shape: f32[1,1024], index: 2, kind: input, shape index: {}]   ;;  %s1809_s3 = inlined_call_operand.hbm [shape: f32[1024,128], index: 3, kind: input, shape index: {}]   ;;  %s1810_s4 = inlined_call_operand.vmem [shape: f32[1,128], index: 4, kind: input, shape index: {}]   ;;  %s1811_s5 = inlined_call_operand.hbm [shape: f32[128,128], index: 5, kind: input, shape index: {}]   ;;  %s1812_s6 = inlined_call_operand.vmem [shape: f32[1,128], index: 6, kind: input, shape index: {}]   ;;  %s1813_s7 = inlined_call_operand.hbm [shape: f32[2,128], index: 7, kind: output, shape index: {0}]   ;;  %s1814_s8 = inlined_call_operand.hbm [shape: f32[2,128], index: 8, kind: output, shape index: {1}]  }
   0x1   :  { %15 = vsyncpa [#allocation7], 0 }
   0x2   :  { %16 = vsyncpa [#allocation10], 0 }
   0x3   :  { %17 = vsyncpa [#allocation5], 0 }
   0x4   :  { %18 = vsyncpa [#allocation14], 0  ;;  %s1588_s27 = smov [#allocation6]   ;;  %s1589_s29 = smov [#allocation9]  }
   0x5   :  { %s37_s28 = sshll.u32 %s1588_s27, 4  ;;  %s56_s30 = sshll.u32 %s1589_s29, 4  ;;  %s38_s28 = int_to_ptr.vmem [resolvable:$true] %s37_s28  ;;  %s1647_s30 = int_to_ptr.vmem [resolvable:$true] %s56_s30 }
   0x6   :  { %s1424_s11 = scalar_lea.hbm %s1807_s1, 512 }
   0x7   :  { %p1425_p0 = scmp.ne.s32.totalorder %s1807_s1, %s1424_s11  ;;  %p1428_p1 = scmp.lt.u32.totalorder %s1424_s11, %s1807_s1 }
   0x9   :  { %p1430_p2 = pnand %p1428_p1, %p1425_p0 }
   0xb   :  { %1433 = shalt.err (!%p1430_p2)
}
   0xc   :  { %s1434_s16 = scalar_lea.vmem %s38_s28, 512  ;;  %p1439_p4 = scmp.lt.s32.totalorder %s38_s28, %s38_s28 }
   0xd   :  { %p1435_p3 = scmp.ne.s32.totalorder %s38_s28, %s1434_s16  ;;  %p1440_p5 = scmp.lt.s32.totalorder %s1434_s16, %s1434_s16 }
   0xf   :  { %p1441_p6 = por %p1440_p5, %p1439_p4 }
  0x11   :  { %p1442_p7 = pnand %p1441_p6, %p1435_p3 }
  0x13   :  { %1445 = shalt.err (!%p1442_p7)
}
  0x14   :  { %40 = dma.hbm_to_vmem [thread:$0]  %s1807_s1, 512, %s38_s28, [#allocation7]  }
  0x15   :  { %s1446_s21 = scalar_lea.hbm %s1809_s3, 16384 }
  0x16   :  { %p1447_p8 = scmp.ne.s32.totalorder %s1809_s3, %s1446_s21  ;;  %p1450_p9 = scmp.lt.u32.totalorder %s1446_s21, %s1809_s3 }
  0x18   :  { %p1452_p10 = pnand %p1450_p9, %p1447_p8 }
  0x1a   :  { %1455 = shalt.err (!%p1452_p10)
}
  0x1b   :  { %s1456_s26 = scalar_lea.vmem %s1647_s30, 16384  ;;  %p1461_p12 = scmp.lt.s32.totalorder %s1647_s30, %s1647_s30 }
  0x1c   :  { %p1457_p11 = scmp.ne.s32.totalorder %s1647_s30, %s1456_s26  ;;  %p1462_p13 = scmp.lt.s32.totalorder %s1456_s26, %s1456_s26 }
  0x1e   :  { %p1463_p0 = por %p1462_p13, %p1461_p12 }
  0x20   :  { %p1464_p1 = pnand %p1463_p0, %p1457_p11 }
  0x22   :  { %1467 = shalt.err (!%p1464_p1)
}
  0x23   :  { %s1590_s1 = smov 128   ;;  %s1591_s27 = smov 8  }
  0x24   :  { %62 = dma.hbm_to_vmem [thread:$0]  %s1809_s3, 16384, %s1647_s30, [#allocation10], %s1590_s1, %s1590_s1, %s1591_s27  }
  0x25   :  { %s1592_s9 = smov [#allocation3]   ;;  %s1468_s13 = scalar_lea.hbm %s1806_s0, 128 }
  0x26   :  { %s24_s10 = sshll.u32 %s1592_s9, 4  ;;  %p1469_p2 = scmp.ne.s32.totalorder %s1806_s0, %s1468_s13  ;;  %s25_s10 = int_to_ptr.vmem [resolvable:$true] %s24_s10 }
  0x27   :  { %p1472_p3 = scmp.lt.u32.totalorder %s1468_s13, %s1806_s0 }
  0x29   :  { %p1474_p4 = pnand %p1472_p3, %p1469_p2 }
  0x2b   :  { %1477 = shalt.err (!%p1474_p4)
}
  0x2c   :  { %s1478_s18 = scalar_lea.vmem %s25_s10, 128  ;;  %p1483_p6 = scmp.lt.s32.totalorder %s25_s10, %s25_s10 }
  0x2d   :  { %p1479_p5 = scmp.ne.s32.totalorder %s25_s10, %s1478_s18  ;;  %p1484_p7 = scmp.lt.s32.totalorder %s1478_s18, %s1478_s18 }
  0x2f   :  { %p1485_p8 = por %p1484_p7, %p1483_p6 }
  0x31   :  { %p1486_p9 = pnand %p1485_p8, %p1479_p5 }
  0x33   :  { %1489 = shalt.err (!%p1486_p9)
}
  0x34   :  { %s1593_s3 = smov 64   ;;  %s1594_s30 = smov 4  }
  0x35   :  { %30 = dma.hbm_to_vmem [thread:$0]  %s1806_s0, 128, %s25_s10, [#allocation4], %s1593_s3, %s1593_s3, %s1594_s30  }
  0x36   :  { %s1595_s21 = smov [#allocation8]   ;;  %s1596_s23 = smov [#allocation11]  }
  0x37   :  { %s47_s22 = sshll.u32 %s1595_s21, 4  ;;  %s70_s24 = sshll.u32 %s1596_s23, 4  ;;  %s48_s22 = int_to_ptr.vmem [resolvable:$true] %s47_s22  ;;  %s71_s24 = int_to_ptr.vmem [resolvable:$true] %s70_s24 }
  0x38   :  { %s1490_s28 = scalar_lea.hbm %s1808_s2, 128 }
  0x39   :  { %p1491_p10 = scmp.ne.s32.totalorder %s1808_s2, %s1490_s28  ;;  %p1494_p11 = scmp.lt.u32.totalorder %s1490_s28, %s1808_s2 }
  0x3b   :  { %p1496_p12 = pnand %p1494_p11, %p1491_p10 }
  0x3d   :  { %1499 = shalt.err (!%p1496_p12)
}
  0x3e   :  { %s1500_s0 = scalar_lea.vmem %s48_s22, 128  ;;  %p1505_p0 = scmp.lt.s32.totalorder %s48_s22, %s48_s22 }
  0x3f   :  { %p1501_p13 = scmp.ne.s32.totalorder %s48_s22, %s1500_s0  ;;  %p1506_p1 = scmp.lt.s32.totalorder %s1500_s0, %s1500_s0 }
  0x41   :  { %p1507_p2 = por %p1506_p1, %p1505_p0 }
  0x43   :  { %p1508_p3 = pnand %p1507_p2, %p1501_p13 }
  0x45   :  { %1511 = shalt.err (!%p1508_p3)
}
  0x46   :  { %50 = dma.hbm_to_vmem [thread:$0]  %s1808_s2, 128, %s48_s22, [#allocation7]  }
  0x47   :  { %s1512_s16 = scalar_lea.hbm %s1811_s5, 2048 }
  0x48   :  { %p1513_p4 = scmp.ne.s32.totalorder %s1811_s5, %s1512_s16  ;;  %p1516_p5 = scmp.lt.u32.totalorder %s1512_s16, %s1811_s5 }
  0x4a   :  { %p1518_p6 = pnand %p1516_p5, %p1513_p4 }
  0x4c   :  { %1521 = shalt.err (!%p1518_p6)
}
  0x4d   :  { %s1522_s19 = scalar_lea.vmem %s71_s24, 2048  ;;  %p1527_p8 = scmp.lt.s32.totalorder %s71_s24, %s71_s24 }
  0x4e   :  { %p1523_p7 = scmp.ne.s32.totalorder %s71_s24, %s1522_s19  ;;  %p1528_p9 = scmp.lt.s32.totalorder %s1522_s19, %s1522_s19 }
  0x50   :  { %p1529_p10 = por %p1528_p9, %p1527_p8 }
  0x52   :  { %p1530_p11 = pnand %p1529_p10, %p1523_p7 }
  0x54   :  { %1533 = shalt.err (!%p1530_p11)
}
  0x55   :  { %76 = dma.hbm_to_vmem [thread:$0]  %s1811_s5, 2048, %s71_s24, [#allocation10], %s1590_s1, %s1590_s1, %s1591_s27  }
  0x56   :  { %1578 = dma.done.wait [#allocation4], 128  }
  0x57   :  { %1579 = vsyncadd [#allocation4], 4294967168 }
  0x58   :  { %1580 = dma.done.wait [#allocation7], 640  }
  0x59   :  { %1581 = vsyncadd [#allocation7], 4294966656 }
  0x5a   :  { %1582 = dma.done.wait [#allocation10], 18432  }
  0x5b   :  { %1583 = vsyncadd [#allocation10], 4294948864  ;;  %v1059_v0 = vld [vmem:[#allocation3] sm:$0xff]   ;;  %vm111_vm0 = vcmask 1043456   ;;  %vm98_vm1 = vcmask 25600   ;;  %v1597_v11 = vmov 0.0   ;;  %v124_v58 = vlaneseq }
  0x5c   :  { %v1060_v1 = vunpack.c.l.bf16 %v1059_v0  ;;  %v1061_v2 = vunpack.c.h.bf16 %v1059_v0  ;;  %99 = vst.msk [vmem:[#allocation2] sm:$0x3] %vm98_vm1, %v1597_v11  ;;  %283 = vmatprep.mubr.f32.mxu1 %v1597_v11  ;;  %v145_v12 = vld [vmem:[#allocation6] sm:$0xff]  ;;  %v1727_v13 = vld [vmem:[#allocation6 + $0x8] sm:$0xff]  ;;  %v520_v17 = vld [vmem:[#allocation9 + $0x88] sm:$0xff]  ;;  %vm134_vm2 = vcmask 1041409  }
  0x5d   :  { %v195_v14 = vcombine.high %v145_v12, %v145_v12  ;;  %v196_v15 = vcombine.high %v1727_v13, %v1727_v13  ;;  %v519_v16 = vld [vmem:[#allocation9 + $0x80] sm:$0xff]  ;;  %v504_v20 = vld [vmem:[#allocation9 + $0x8] sm:$0xff]  ;;  %v521_v21 = vld [vmem:[#allocation9 + $0x90] sm:$0xff]  ;;  %v125_v59 = vand.u32 127, %v124_v58  ;;  %v1734_v60 = vshrl.u32 %v124_v58, 7  ;;  %s1600_s27 = smov [#allocation12]  }
  0x5e   :  { %v107_v3 = vcombine.high %v1060_v1, %v1060_v1  ;;  %v112_v4 = vsel %vm111_vm0, %v1060_v1, 0.0  ;;  %v108_v5 = vcombine.high %v1061_v2, %v1061_v2  ;;  %v117_v7 = vsel %vm111_vm0, %v1061_v2, 0.0  ;;  %v503_v18 = vld [vmem:[#allocation9] sm:$0xff]  ;;  %v522_v22 = vld [vmem:[#allocation9 + $0x98] sm:$0xff]  ;;  %v505_v25 = vld [vmem:[#allocation9 + $0x10] sm:$0xff]  ;;  %s1019_s21 = sshll.u32 %s1600_s27, 4  ;;  %s1020_s21 = int_to_ptr.vmem [resolvable:$true] %s1019_s21 }
  0x5f   :  { %1044 = vmatprep.subr.msk.mxu1 %vm111_vm0, %v195_v14  ;;  %v1254_v19 = vpack.c.bf16 %v520_v17, %v519_v16  ;;  %v1256_v23 = vpack.c.bf16 %v504_v20, %v503_v18  ;;  %v1258_v24 = vpack.c.bf16 %v522_v22, %v521_v21  ;;  %v506_v26 = vld [vmem:[#allocation9 + $0x18] sm:$0xff]  ;;  %v523_v28 = vld [vmem:[#allocation9 + $0xa0] sm:$0xff]  ;;  %v524_v29 = vld [vmem:[#allocation9 + $0xa8] sm:$0xff]  ;;  %v128_v62 = vsub.s32 %v125_v59, %v1734_v60  ;;  %s1534_s22 = scalar_lea.vmem %s1020_s21, 32  ;;  %p1539_p13 = scmp.lt.s32.totalorder %s1020_s21, %s1020_s21 }
  0x60   :  { %v113_v6 = vsel %vm111_vm0, %v107_v3, 0.0  ;;  %v118_v8 = vsel %vm111_vm0, %v108_v5, 0.0  ;;  %1045 = vmatpush1.msk.msra.mxu1 %vm111_vm0, %v145_v12  ;;  %v1260_v27 = vpack.c.bf16 %v506_v26, %v505_v25  ;;  %v1262_v30 = vpack.c.bf16 %v524_v29, %v523_v28  ;;  %v507_v31 = vld [vmem:[#allocation9 + $0x20] sm:$0xff]  ;;  %v508_v32 = vld [vmem:[#allocation9 + $0x28] sm:$0xff]  ;;  %v525_v33 = vld [vmem:[#allocation9 + $0xb0] sm:$0xff]  ;;  %p1535_p12 = scmp.ne.s32.totalorder %s1020_s21, %s1534_s22  ;;  %p1540_p0 = scmp.lt.s32.totalorder %s1534_s22, %s1534_s22 }
  0x61   :  { %v114_v9 = vadd.f32 %v113_v6, %v112_v4  ;;  %v119_v10 = vadd.f32 %v118_v8, %v117_v7  ;;  %1047 = vmatprep.subr.msk.mxu1 %vm111_vm0, %v196_v15  ;;  %1255 = vmatprep.subr.bf16.mxu0 %v1254_v19  ;;  %v526_v34 = vld [vmem:[#allocation9 + $0xb8] sm:$0xff]  ;;  %v1264_v35 = vpack.c.bf16 %v508_v32, %v507_v31  ;;  %v509_v37 = vld [vmem:[#allocation9 + $0x30] sm:$0xff]  ;;  %v527_v39 = vld [vmem:[#allocation9 + $0xc0] sm:$0xff]  ;;  %vm199_vm3 = vcmask 31744  }
  0x62   :  { %1257 = vmatpush3.bf16.msra.mxu0 %v1256_v23  ;;  %v1266_v36 = vpack.c.bf16 %v526_v34, %v525_v33  ;;  %v510_v38 = vld [vmem:[#allocation9 + $0x38] sm:$0xff]  ;;  %v528_v40 = vld [vmem:[#allocation9 + $0xc8] sm:$0xff]  ;;  %v511_v43 = vld [vmem:[#allocation9 + $0x40] sm:$0xff]  ;;  %vm1599_vm4 = vmmov 0   ;;  %p1541_p1 = por %p1540_p0, %p1539_p13 }
  0x63   :  { %115 = vadd.xlane.f32.xlu0 %v114_v9  ;;  %1259 = vmatprep.subr.bf16.mxu0 %v1258_v24  ;;  %v1268_v41 = vpack.c.bf16 %v510_v38, %v509_v37  ;;  %v1270_v42 = vpack.c.bf16 %v528_v40, %v527_v39  ;;  %v512_v44 = vld [vmem:[#allocation9 + $0x48] sm:$0xff]  ;;  %v529_v45 = vld [vmem:[#allocation9 + $0xd0] sm:$0xff]  ;;  %v530_v46 = vld [vmem:[#allocation9 + $0xd8] sm:$0xff] }
  0x64   :  { %v1272_v47 = vpack.c.bf16 %v512_v44, %v511_v43  ;;  %v1274_v48 = vpack.c.bf16 %v530_v46, %v529_v45  ;;  %v513_v49 = vld [vmem:[#allocation9 + $0x50] sm:$0xff]  ;;  %v514_v50 = vld [vmem:[#allocation9 + $0x58] sm:$0xff]  ;;  %v531_v51 = vld [vmem:[#allocation9 + $0xe0] sm:$0xff]  ;;  %p1542_p2 = pnand %p1541_p1, %p1535_p12 }
  0x65   :  { %v532_v52 = vld [vmem:[#allocation9 + $0xe8] sm:$0xff]  ;;  %v1276_v53 = vpack.c.bf16 %v514_v50, %v513_v49  ;;  %v515_v55 = vld [vmem:[#allocation9 + $0x60] sm:$0xff]  ;;  %v148_v9 = vld [vmem:[#allocation6 + $0x18] sm:$0xff] }
  0x66   :  { %1261 = vmatpush3.bf16.msra.mxu0 %v1260_v27  ;;  %v1278_v54 = vpack.c.bf16 %v532_v52, %v531_v51  ;;  %v516_v56 = vld [vmem:[#allocation9 + $0x68] sm:$0xff]  ;;  %v551_v12 = vld [vmem:[#allocation9 + $0x180] sm:$0xff]  ;;  %v553_v18 = vld [vmem:[#allocation9 + $0x190] sm:$0xff] }
  0x67   :  { %120 = vadd.xlane.f32.xlu0 %v119_v10  ;;  %1263 = vmatprep.subr.bf16.mxu0 %v1262_v30  ;;  %v1280_v57 = vpack.c.bf16 %v516_v56, %v515_v55  ;;  %v100_v1 = vld [vmem:[#allocation2] sm:$0x3]  ;;  %v198_v10 = vcombine.high %v148_v9, %v148_v9  ;;  %v535_v16 = vld [vmem:[#allocation9 + $0x100] sm:$0xff]  ;;  %v537_v21 = vld [vmem:[#allocation9 + $0x110] sm:$0xff] }
  0x68   :  { %v147_v5 = vld [vmem:[#allocation6 + $0x10] sm:$0xff]  ;;  %v538_v22 = vld [vmem:[#allocation9 + $0x118] sm:$0xff]  ;;  %v555_v23 = vld [vmem:[#allocation9 + $0x1a0] sm:$0xff] }
  0x69   :  { %v197_v8 = vcombine.high %v147_v5, %v147_v5  ;;  %v552_v14 = vld [vmem:[#allocation9 + $0x188] sm:$0xff]  ;;  %v1292_v25 = vpack.c.bf16 %v538_v22, %v537_v21  ;;  %v539_v27 = vld [vmem:[#allocation9 + $0x120] sm:$0xff]  ;;  %v557_v29 = vld [vmem:[#allocation9 + $0x1b0] sm:$0xff] }
  0x6a   :  { %1265 = vmatpush3.bf16.msra.mxu0 %v1264_v35  ;;  %v1286_v15 = vpack.c.bf16 %v552_v14, %v551_v12  ;;  %v536_v17 = vld [vmem:[#allocation9 + $0x108] sm:$0xff]  ;;  %v558_v30 = vld [vmem:[#allocation9 + $0x1b8] sm:$0xff]  ;;  %v541_v33 = vld [vmem:[#allocation9 + $0x130] sm:$0xff]  ;;  %v153_v12 = vsub.s32 0, %v1734_v60 }
  0x6b   :  { %1267 = vmatprep.subr.bf16.mxu0 %v1266_v36  ;;  %v1288_v19 = vpack.c.bf16 %v536_v17, %v535_v16  ;;  %v556_v24 = vld [vmem:[#allocation9 + $0x1a8] sm:$0xff]  ;;  %v1298_v32 = vpack.c.bf16 %v558_v30, %v557_v29  ;;  %v542_v34 = vld [vmem:[#allocation9 + $0x138] sm:$0xff]  ;;  %v559_v35 = vld [vmem:[#allocation9 + $0x1c0] sm:$0xff]  ;;  %v161_v17 = vsub.s32 2, %v1734_v60 }
  0x6c   :  { %v1294_v26 = vpack.c.bf16 %v556_v24, %v555_v23  ;;  %v540_v28 = vld [vmem:[#allocation9 + $0x128] sm:$0xff]  ;;  %v1300_v37 = vpack.c.bf16 %v542_v34, %v541_v33  ;;  %v543_v39 = vld [vmem:[#allocation9 + $0x140] sm:$0xff]  ;;  %v545_v45 = vld [vmem:[#allocation9 + $0x150] sm:$0xff] }
  0x6d   :  { %v1296_v31 = vpack.c.bf16 %v540_v28, %v539_v27  ;;  %v560_v36 = vld [vmem:[#allocation9 + $0x1c8] sm:$0xff]  ;;  %v546_v46 = vld [vmem:[#allocation9 + $0x158] sm:$0xff]  ;;  %v563_v50 = vld [vmem:[#allocation9 + $0x1e0] sm:$0xff] }
  0x6e   :  { %1269 = vmatpush3.bf16.msra.mxu0 %v1268_v41  ;;  %v1302_v38 = vpack.c.bf16 %v560_v36, %v559_v35  ;;  %v544_v40 = vld [vmem:[#allocation9 + $0x148] sm:$0xff]  ;;  %v561_v41 = vld [vmem:[#allocation9 + $0x1d0] sm:$0xff]  ;;  %v534_v49 = vld [vmem:[#allocation9 + $0xf8] sm:$0xff] }
  0x6f   :  { %1271 = vmatprep.subr.bf16.mxu0 %v1270_v42  ;;  %v562_v42 = vld [vmem:[#allocation9 + $0x1d8] sm:$0xff]  ;;  %v1304_v43 = vpack.c.bf16 %v544_v40, %v543_v39  ;;  %v564_v52 = vld [vmem:[#allocation9 + $0x1e8] sm:$0xff]  ;;  %v569_v27 = vld [vmem:[#allocation9 + $0x210] sm:$0xff] }
  0x70   :  { %v1306_v44 = vpack.c.bf16 %v562_v42, %v561_v41  ;;  %v1310_v55 = vpack.c.bf16 %v564_v52, %v563_v50  ;;  %v548_v58 = vld [vmem:[#allocation9 + $0x168] sm:$0xff]  ;;  %v586_v21 = vld [vmem:[#allocation9 + $0x298] sm:$0xff]  ;;  %v587_v34 = vld [vmem:[#allocation9 + $0x2a0] sm:$0xff] }
  0x71   :  { %v570_v28 = vld [vmem:[#allocation9 + $0x218] sm:$0xff]  ;;  %v600_v33 = vld [vmem:[#allocation9 + $0x308] sm:$0xff]  ;;  %v601_v50 = vld [vmem:[#allocation9 + $0x310] sm:$0xff] }
  0x72   :  { %1273 = vmatpush3.bf16.msra.mxu0 %v1272_v47  ;;  %v1308_v47 = vpack.c.bf16 %v546_v46, %v545_v45  ;;  %v588_v36 = vld [vmem:[#allocation9 + $0x2a8] sm:$0xff]  ;;  %v1324_v40 = vpack.c.bf16 %v570_v28, %v569_v27  ;;  %v571_v45 = vld [vmem:[#allocation9 + $0x220] sm:$0xff]  ;;  %v589_v52 = vld [vmem:[#allocation9 + $0x2b0] sm:$0xff] }
  0x73   :  { %1275 = vmatprep.subr.bf16.mxu0 %v1274_v48  ;;  %v533_v48 = vld [vmem:[#allocation9 + $0xf0] sm:$0xff]  ;;  %v572_v46 = vld [vmem:[#allocation9 + $0x228] sm:$0xff] }
  0x74   :  { %v1282_v51 = vpack.c.bf16 %v534_v49, %v533_v48  ;;  %v1326_v48 = vpack.c.bf16 %v588_v36, %v587_v34  ;;  %v577_v28 = vld [vmem:[#allocation9 + $0x250] sm:$0xff]  ;;  %v595_v34 = vld [vmem:[#allocation9 + $0x2e0] sm:$0xff] }
  0x75   :  { %v625_v36 = vld [vmem:[#allocation9 + $0x3d0] sm:$0xff] }
  0x76   :  { %1277 = vmatpush3.bf16.msra.mxu0 %v1276_v53  ;;  %v517_v53 = vld [vmem:[#allocation9 + $0x70] sm:$0xff] }
  0x77   :  { %1279 = vmatprep.subr.bf16.mxu0 %v1278_v54  ;;  %v518_v54 = vld [vmem:[#allocation9 + $0x78] sm:$0xff] }
  0x78   :  { %v1284_v56 = vpack.c.bf16 %v518_v54, %v517_v53  ;;  %v590_v54 = vld [vmem:[#allocation9 + $0x2b8] sm:$0xff] }
  0x7a   :  { %1281 = vmatpush3.bf16.msra.mxu0 %v1280_v57  ;;  %v547_v57 = vld [vmem:[#allocation9 + $0x160] sm:$0xff] }
  0x7b   :  { %1283 = vmatprep.subr.bf16.mxu0 %v1282_v51  ;;  %v1312_v59 = vpack.c.bf16 %v548_v58, %v547_v57  ;;  %v602_v51 = vld [vmem:[#allocation9 + $0x318] sm:$0xff]  ;;  %v1328_v58 = vpack.c.bf16 %v572_v46, %v571_v45  ;;  %v597_v46 = vld [vmem:[#allocation9 + $0x2f0] sm:$0xff] }
  0x7c   :  { %v610_v45 = vld [vmem:[#allocation9 + $0x358] sm:$0xff] }
  0x7e   :  { %1285 = vmatpush3.bf16.msra.mxu0 %v1284_v56  ;;  %v620_v56 = vld [vmem:[#allocation9 + $0x3a8] sm:$0xff] }
  0xf0   :  { %v116_v61 = vpop.xlane.xlu0 %115 }
  0xf1   :  { %v129_v0 = vrot.slane %v116_v61, %v128_v62  ;;  %v565_v61 = vld [vmem:[#allocation9 + $0x1f0] sm:$0xff] }
  0xf4   :  { %v121_v63 = vpop.xlane.xlu0 %120 }
  0xf5   :  { %v133_v2 = vrot.slane %v121_v63, %v128_v62  ;;  %v566_v62 = vld [vmem:[#allocation9 + $0x1f8] sm:$0xff]  ;;  %v583_v63 = vld [vmem:[#allocation9 + $0x280] sm:$0xff] }
  0xf7   :  { %v135_v3 = vsel %vm134_vm2, %v133_v2, %v129_v0  ;;  %v1314_v0 = vpack.c.bf16 %v566_v62, %v565_v61  ;;  %v549_v2 = vld [vmem:[#allocation9 + $0x170] sm:$0xff]  ;;  %v1356_v62 = vpack.c.bf16 %v602_v51, %v601_v50 }
  0xf8   :  { %v137_v4 = vadd.f32 %v135_v3, %v100_v1  ;;  %v584_v1 = vld [vmem:[#allocation9 + $0x288] sm:$0xff]  ;;  %v550_v3 = vld [vmem:[#allocation9 + $0x178] sm:$0xff] }
  0xfa   :  { %139 = vst.msk [vmem:[#allocation2] sm:$0x3] %vm98_vm1, %v137_v4  ;;  %v1318_v4 = vpack.c.bf16 %v584_v1, %v583_v63  ;;  %v573_v63 = vld [vmem:[#allocation9 + $0x230] sm:$0xff]  ;;  %v1330_v1 = vpack.c.bf16 %v590_v54, %v589_v52  ;;  %v169_v54 = vsub.s32 4, %v1734_v60 }
  0xfb   :  { %v581_v52 = vld [vmem:[#allocation9 + $0x270] sm:$0xff] }
  0xfc   :  { %1319 = vmatprep.subr.bf16.mxu0 %v1318_v4  ;;  %v604_v4 = vld [vmem:[#allocation9 + $0x328] sm:$0xff] }
 0x101   :  { %v143_v6 = vld [vmem:[#allocation2] sm:$0x3] }
 0x102   :  { %v144_v7 = vmul.f32 0.00390625, %v143_v6  ;;  %v615_v6 = vld [vmem:[#allocation9 + $0x380] sm:$0xff] }
 0x104   :  { %1046 = vmatmul.mubr.msk.f32.vlgmr.msra.gmra.mrb[0].mxu1 %vm199_vm3, %v144_v7 }
 0x105   :  { %1048 = vmatpush1.msk.msra.mxu1 %vm111_vm0, %v1727_v13  ;;  %354 = vmatprep.mubr.f32.mxu1 %v1597_v11  ;;  %v554_v13 = vld [vmem:[#allocation9 + $0x198] sm:$0xff] }
 0x106   :  { %1050 = vmatprep.subr.msk.mxu1 %vm111_vm0, %v197_v8  ;;  %v1290_v20 = vpack.c.bf16 %v554_v13, %v553_v18  ;;  %v567_v18 = vld [vmem:[#allocation9 + $0x200] sm:$0xff]  ;;  %v568_v13 = vld [vmem:[#allocation9 + $0x208] sm:$0xff] }
 0x108   :  { %1049 = vmatmul.mubr.msk.f32.vlgmr.msra.gmra.mrb[2].mxu1 %vm199_vm3, %v144_v7 }
 0x109   :  { %1051 = vmatpush1.msk.msra.mxu1 %vm111_vm0, %v147_v5  ;;  %425 = vmatprep.mubr.f32.mxu1 %v1597_v11  ;;  %v1316_v5 = vpack.c.bf16 %v550_v3, %v549_v2  ;;  %v603_v3 = vld [vmem:[#allocation9 + $0x320] sm:$0xff] }
 0x10a   :  { %1053 = vmatprep.subr.msk.mxu1 %vm111_vm0, %v198_v10  ;;  %v1752_v10 = vld [vmem:[#allocation8] sm:$0xff] }
 0x10b   :  { %v154_v16 = vrot.slane %v1752_v10, %v153_v12  ;;  %v162_v30 = vrot.slane %v1752_v10, %v161_v17  ;;  %v575_v17 = vld [vmem:[#allocation9 + $0x240] sm:$0xff] }
 0x10c   :  { %1052 = vmatmul.mubr.msk.f32.vlgmr.msra.gmra.mrb[4].mxu1 %vm199_vm3, %v144_v7 }
 0x10d   :  { %1054 = vmatpush1.msk.msra.mxu1 %vm111_vm0, %v148_v9  ;;  %496 = vmatprep.mubr.f32.mxu1 %v1597_v11  ;;  %v157_v9 = vsub.s32 1, %v1734_v60 }
 0x10e   :  { %1287 = vmatprep.subr.bf16.mxu1 %v1286_v15  ;;  %v165_v15 = vsub.s32 3, %v1734_v60 }
 0x10f   :  { %v158_v14 = vrot.slane %v1752_v10, %v157_v9  ;;  %v622_v9 = vld [vmem:[#allocation9 + $0x3b8] sm:$0xff] }
 0x110   :  { %1055 = vmatmul.mubr.msk.f32.vlgmr.msra.gmra.mrb[6].mxu1 %vm199_vm3, %v144_v7  ;;  %v616_v7 = vld [vmem:[#allocation9 + $0x388] sm:$0xff]  ;;  %v166_v24 = vrot.slane %v1752_v10, %v165_v15 }
 0x111   :  { %1289 = vmatpush3.bf16.msra.mxu1 %v1288_v19  ;;  %v1350_v8 = vpack.c.bf16 %v616_v7, %v615_v6  ;;  %v592_v7 = vld [vmem:[#allocation9 + $0x2c8] sm:$0xff] }
 0x112   :  { %1291 = vmatprep.subr.bf16.mxu1 %v1290_v20  ;;  %v585_v20 = vld [vmem:[#allocation9 + $0x290] sm:$0xff] }
 0x115   :  { %1293 = vmatpush3.bf16.msra.mxu1 %v1292_v25  ;;  %v1320_v25 = vpack.c.bf16 %v568_v13, %v567_v18  ;;  %v576_v18 = vld [vmem:[#allocation9 + $0x248] sm:$0xff] }
 0x116   :  { %1295 = vmatprep.subr.bf16.mxu1 %v1294_v26  ;;  %v173_v26 = vsub.s32 5, %v1734_v60 }
 0x118   :  { %v174_v42 = vrot.slane %v1752_v10, %v173_v26  ;;  %v1336_v26 = vpack.c.bf16 %v576_v18, %v575_v17  ;;  %v921_v18 = vld [vmem:[#allocation11 + $0x18] sm:$0xff] }
 0x119   :  { %1297 = vmatpush3.bf16.msra.mxu1 %v1296_v31  ;;  %v1322_v31 = vpack.c.bf16 %v586_v21, %v585_v20  ;;  %v605_v20 = vld [vmem:[#allocation9 + $0x330] sm:$0xff]  ;;  %v606_v21 = vld [vmem:[#allocation9 + $0x338] sm:$0xff] }
 0x11a   :  { %1299 = vmatprep.subr.bf16.mxu1 %v1298_v32  ;;  %v599_v32 = vld [vmem:[#allocation9 + $0x300] sm:$0xff]  ;;  %v1364_v27 = vpack.c.bf16 %v606_v21, %v605_v20  ;;  %v924_v20 = vld [vmem:[#allocation11 + $0x30] sm:$0xff]  ;;  %v925_v21 = vld [vmem:[#allocation11 + $0x38] sm:$0xff] }
 0x11d   :  { %1301 = vmatpush3.bf16.msra.mxu1 %v1300_v37  ;;  %v617_v37 = vld [vmem:[#allocation9 + $0x390] sm:$0xff] }
 0x11e   :  { %1303 = vmatprep.subr.bf16.mxu1 %v1302_v38  ;;  %v618_v38 = vld [vmem:[#allocation9 + $0x398] sm:$0xff] }
 0x11f   :  { %v1354_v49 = vpack.c.bf16 %v618_v38, %v617_v37  ;;  %v626_v37 = vld [vmem:[#allocation9 + $0x3d8] sm:$0xff] }
 0x121   :  { %1305 = vmatpush3.bf16.msra.mxu1 %v1304_v43  ;;  %v1352_v43 = vpack.c.bf16 %v600_v33, %v599_v32  ;;  %v607_v32 = vld [vmem:[#allocation9 + $0x340] sm:$0xff]  ;;  %v608_v33 = vld [vmem:[#allocation9 + $0x348] sm:$0xff] }
 0x122   :  { %1307 = vmatprep.subr.bf16.mxu1 %v1306_v44  ;;  %v181_v44 = vsub.s32 7, %v1734_v60 }
 0x124   :  { %v182_v61 = vrot.slane %v1752_v10, %v181_v44  ;;  %v609_v44 = vld [vmem:[#allocation9 + $0x350] sm:$0xff] }
 0x125   :  { %1309 = vmatpush3.bf16.msra.mxu1 %v1308_v47  ;;  %v1372_v51 = vpack.c.bf16 %v610_v45, %v609_v44 }
 0x126   :  { %1311 = vmatprep.subr.bf16.mxu1 %v1310_v55  ;;  %v619_v55 = vld [vmem:[#allocation9 + $0x3a0] sm:$0xff] }
 0x127   :  { %v1358_v2 = vpack.c.bf16 %v620_v56, %v619_v55 }
 0x129   :  { %1313 = vmatpush3.bf16.msra.mxu1 %v1312_v59 }
 0x12a   :  { %1315 = vmatprep.subr.bf16.mxu1 %v1314_v0  ;;  %v574_v0 = vld [vmem:[#allocation9 + $0x238] sm:$0xff] }
 0x12b   :  { %v1332_v15 = vpack.c.bf16 %v574_v0, %v573_v63 }
 0x12d   :  { %1317 = vmatpush3.bf16.msra.mxu1 %v1316_v5  ;;  %v591_v5 = vld [vmem:[#allocation9 + $0x2c0] sm:$0xff] }
 0x12e   :  { %1351 = vmatprep.subr.bf16.mxu1 %v1350_v8  ;;  %v621_v8 = vld [vmem:[#allocation9 + $0x3b0] sm:$0xff]  ;;  %v1334_v13 = vpack.c.bf16 %v592_v7, %v591_v5  ;;  %v614_v5 = vld [vmem:[#allocation9 + $0x378] sm:$0xff] }
 0x1d7   :  { %v285_v19 = vpop.f32.mrb[0].mxu1 }
 0x1d8   :  { %v287_v22 = vpop.f32.mrb[1].mxu1  ;;  %v286_v29 = vadd.f32 %v285_v19, %v154_v16  ;;  %v1360_v16 = vpack.c.bf16 %v604_v4, %v603_v3  ;;  %v1362_v19 = vpack.c.bf16 %v622_v9, %v621_v8  ;;  %v613_v4 = vld [vmem:[#allocation9 + $0x370] sm:$0xff] }
 0x1d9   :  { %v288_v23 = vadd.f32 %v287_v22, %v158_v14  ;;  %v593_v22 = vld [vmem:[#allocation9 + $0x2d0] sm:$0xff]  ;;  %v1380_v7 = vpack.c.bf16 %v614_v5, %v613_v4 }
 0x1db   :  { %v356_v35 = vpop.f32.mrb[2].mxu1  ;;  %702 = vmatprep.mubr.f32.mxu0 %v288_v23  ;;  %v594_v23 = vld [vmem:[#allocation9 + $0x2d8] sm:$0xff] }
 0x1dc   :  { %v358_v39 = vpop.f32.mrb[3].mxu1  ;;  %703 = vmatmul.mubr.f32.vlgmr.msra.gmra.mrb[0].mxu0 %v286_v29  ;;  %v357_v47 = vadd.f32 %v356_v35, %v162_v30  ;;  %v578_v29 = vld [vmem:[#allocation9 + $0x258] sm:$0xff]  ;;  %v1338_v30 = vpack.c.bf16 %v594_v23, %v593_v22  ;;  %v596_v35 = vld [vmem:[#allocation9 + $0x2e8] sm:$0xff]  ;;  %v926_v22 = vld [vmem:[#allocation11 + $0x40] sm:$0xff] }
 0x1dd   :  { %v359_v41 = vadd.f32 %v358_v39, %v166_v24  ;;  %1321 = vmatpush3.bf16.msra.mxu0 %v1320_v25  ;;  %v623_v24 = vld [vmem:[#allocation9 + $0x3c0] sm:$0xff]  ;;  %v624_v25 = vld [vmem:[#allocation9 + $0x3c8] sm:$0xff]  ;;  %v1340_v38 = vpack.c.bf16 %v578_v29, %v577_v28  ;;  %v1368_v39 = vpack.c.bf16 %v608_v33, %v607_v32  ;;  %v933_v32 = vld [vmem:[#allocation11 + $0x78] sm:$0xff] }
 0x1de   :  { %1323 = vmatprep.subr.bf16.mxu0 %v1322_v31  ;;  %v1366_v31 = vpack.c.bf16 %v624_v25, %v623_v24  ;;  %v927_v23 = vld [vmem:[#allocation11 + $0x48] sm:$0xff]  ;;  %v928_v25 = vld [vmem:[#allocation11 + $0x50] sm:$0xff]  ;;  %v930_v28 = vld [vmem:[#allocation11 + $0x60] sm:$0xff] }
 0x1df   :  { %v1764_v53 = vpop.f32.mrb[4].mxu1  ;;  %772 = vmatprep.mubr.f32.mxu1 %v359_v41  ;;  %v580_v41 = vld [vmem:[#allocation9 + $0x268] sm:$0xff]  ;;  %v1395_v24 = vpack.c.bf16 %v927_v23, %v926_v22 }
 0x1e0   :  { %v429_v57 = vpop.f32.mrb[5].mxu1  ;;  %773 = vmatmul.mubr.f32.vlgmr.msra.gmra.mrb[8].mxu1 %v357_v47  ;;  %v598_v47 = vld [vmem:[#allocation9 + $0x2f8] sm:$0xff]  ;;  %v931_v29 = vld [vmem:[#allocation11 + $0x68] sm:$0xff] }
 0x1e1   :  { %v430_v59 = vadd.f32 %v429_v57, %v174_v42  ;;  %1325 = vmatpush3.bf16.msra.mxu0 %v1324_v40  ;;  %1353 = vmatpush3.bf16.msra.mxu1 %v1352_v43  ;;  %v579_v40 = vld [vmem:[#allocation9 + $0x260] sm:$0xff]  ;;  %v1342_v42 = vpack.c.bf16 %v596_v35, %v595_v34  ;;  %v1370_v43 = vpack.c.bf16 %v626_v37, %v625_v36  ;;  %v582_v57 = vld [vmem:[#allocation9 + $0x278] sm:$0xff]  ;;  %v1056_v37 = vld [vmem:[%s1810_s4] ss:$0 sm:$0xff] }
 0x1e2   :  { %1327 = vmatprep.subr.bf16.mxu0 %v1326_v48  ;;  %1355 = vmatprep.subr.bf16.mxu1 %v1354_v49  ;;  %v627_v48 = vld [vmem:[#allocation9 + $0x3e0] sm:$0xff]  ;;  %v628_v49 = vld [vmem:[#allocation9 + $0x3e8] sm:$0xff]  ;;  %v1344_v50 = vpack.c.bf16 %v580_v41, %v579_v40  ;;  %v1346_v55 = vpack.c.bf16 %v598_v47, %v597_v46  ;;  %v1348_v63 = vpack.c.bf16 %v582_v57, %v581_v52 }
 0x1e3   :  { %v1767_v6 = vpop.f32.mrb[6].mxu1  ;;  %842 = vmatprep.mubr.f32.mxu0 %v430_v59  ;;  %v1374_v56 = vpack.c.bf16 %v628_v49, %v627_v48  ;;  %v612_v59 = vld [vmem:[#allocation9 + $0x368] sm:$0xff] }
 0x1e4   :  { %v500_v12 = vpop.f32.mrb[7].mxu1 }
 0x1e5   :  { %v501_v14 = vadd.f32 %v500_v12, %v182_v61  ;;  %1329 = vmatpush3.bf16.msra.mxu0 %v1328_v58  ;;  %1357 = vmatpush3.bf16.msra.mxu1 %v1356_v62  ;;  %v611_v58 = vld [vmem:[#allocation9 + $0x360] sm:$0xff]  ;;  %v629_v61 = vld [vmem:[#allocation9 + $0x3f0] sm:$0xff]  ;;  %v630_v62 = vld [vmem:[#allocation9 + $0x3f8] sm:$0xff] }
 0x1e6   :  { %1331 = vmatprep.subr.bf16.mxu0 %v1330_v1  ;;  %1359 = vmatprep.subr.bf16.mxu1 %v1358_v2  ;;  %v1376_v0 = vpack.c.bf16 %v612_v59, %v611_v58  ;;  %v170_v1 = vrot.slane %v1752_v10, %v169_v54  ;;  %v177_v2 = vsub.s32 6, %v1734_v60  ;;  %v1378_v3 = vpack.c.bf16 %v630_v62, %v629_v61  ;;  %v919_v60 = vld [vmem:[#allocation11 + $0x8] sm:$0xff] }
 0x1e7   :  { %912 = vmatprep.mubr.f32.mxu1 %v501_v14  ;;  %v918_v14 = vld [vmem:[#allocation11] sm:$0xff] }
 0x1e8   :  { %v428_v8 = vadd.f32 %v1764_v53, %v170_v1  ;;  %v178_v9 = vrot.slane %v1752_v10, %v177_v2  ;;  %v1383_v17 = vpack.c.bf16 %v919_v60, %v918_v14  ;;  %v923_v53 = vld [vmem:[#allocation11 + $0x28] sm:$0xff] }
 0x1e9   :  { %1333 = vmatpush3.bf16.msra.mxu0 %v1332_v15  ;;  %1361 = vmatpush3.bf16.msra.mxu1 %v1360_v16  ;;  %v920_v15 = vld [vmem:[#allocation11 + $0x10] sm:$0xff]  ;;  %v1598_v16 = vmov 0.0|0.0  }
 0x1ea   :  { %1335 = vmatprep.subr.bf16.mxu0 %v1334_v13  ;;  %1363 = vmatprep.subr.bf16.mxu1 %v1362_v19  ;;  %v499_v12 = vadd.f32 %v1767_v6, %v178_v9  ;;  %v1386_v13 = vpack.c.bf16 %v921_v18, %v920_v15  ;;  %v922_v19 = vld [vmem:[#allocation11 + $0x20] sm:$0xff]  ;;  %v1392_v6 = vpack.c.bf16 %v925_v21, %v924_v20 }
 0x1eb   :  { %v1389_v10 = vpack.c.bf16 %v923_v53, %v922_v19 }
 0x1ed   :  { %1337 = vmatpush3.bf16.msra.mxu0 %v1336_v26  ;;  %1365 = vmatpush3.bf16.msra.mxu1 %v1364_v27  ;;  %v929_v26 = vld [vmem:[#allocation11 + $0x58] sm:$0xff] }
 0x1ee   :  { %1339 = vmatprep.subr.bf16.mxu0 %v1338_v30  ;;  %1367 = vmatprep.subr.bf16.mxu1 %v1366_v31  ;;  %v1398_v27 = vpack.c.bf16 %v929_v26, %v928_v25  ;;  %v1401_v30 = vpack.c.bf16 %v931_v29, %v930_v28  ;;  %v932_v31 = vld [vmem:[#allocation11 + $0x70] sm:$0xff] }
 0x1ef   :  { %v1404_v33 = vpack.c.bf16 %v933_v32, %v932_v31 }
 0x1f1   :  { %1341 = vmatpush3.bf16.msra.mxu0 %v1340_v38  ;;  %1369 = vmatpush3.bf16.msra.mxu1 %v1368_v39 }
 0x1f2   :  { %1343 = vmatprep.subr.bf16.mxu0 %v1342_v42  ;;  %1371 = vmatprep.subr.bf16.mxu1 %v1370_v43 }
 0x1f5   :  { %1345 = vmatpush3.bf16.msra.mxu0 %v1344_v50  ;;  %1373 = vmatpush3.bf16.msra.mxu1 %v1372_v51 }
 0x1f6   :  { %1347 = vmatprep.subr.bf16.mxu0 %v1346_v55  ;;  %1375 = vmatprep.subr.bf16.mxu1 %v1374_v56 }
 0x1f9   :  { %1349 = vmatpush3.bf16.msra.mxu0 %v1348_v63  ;;  %1377 = vmatpush3.bf16.msra.mxu1 %v1376_v0 }
 0x1fa   :  { %1379 = vmatprep.subr.bf16.mxu1 %v1378_v3  ;;  %1382 = vmatprep.subr.bf16.mxu0 %v1598_v16 }
 0x1fc   :  { %843 = vmatmul.mubr.f32.vlgmr.msra.gmra.mrb[2].mxu0 %v428_v8 }
 0x1fd   :  { %1381 = vmatpush3.bf16.msra.mxu1 %v1380_v7  ;;  %1384 = vmatpush3.bf16.msra.mxu0 %v1383_v17 }
 0x1fe   :  { %1385 = vmatprep.subr.bf16.mxu0 %v1598_v16  ;;  %1251 = vmatprep.mubr.msk.f32.mxu0 %vm1599_vm4, %v1597_v11 }
 0x200   :  { %913 = vmatmul.mubr.f32.vlgmr.msra.gmra.mrb[10].mxu1 %v499_v12 }
 0x201   :  { %1387 = vmatpush3.bf16.msra.mxu0 %v1386_v13 }
 0x202   :  { %1388 = vmatprep.subr.bf16.mxu0 %v1598_v16 }
 0x205   :  { %1390 = vmatpush3.bf16.msra.mxu0 %v1389_v10 }
 0x206   :  { %1391 = vmatprep.subr.bf16.mxu0 %v1598_v16 }
 0x209   :  { %1393 = vmatpush3.bf16.msra.mxu0 %v1392_v6 }
 0x20a   :  { %1394 = vmatprep.subr.bf16.mxu0 %v1598_v16 }
 0x20d   :  { %1396 = vmatpush3.bf16.msra.mxu0 %v1395_v24 }
 0x20e   :  { %1397 = vmatprep.subr.bf16.mxu0 %v1598_v16 }
 0x211   :  { %1399 = vmatpush3.bf16.msra.mxu0 %v1398_v27 }
 0x212   :  { %1400 = vmatprep.subr.bf16.mxu0 %v1598_v16 }
 0x215   :  { %1402 = vmatpush3.bf16.msra.mxu0 %v1401_v30 }
 0x216   :  { %1403 = vmatprep.subr.bf16.mxu0 %v1598_v16 }
 0x219   :  { %1405 = vmatpush3.bf16.msra.mxu0 %v1404_v33 }
 0x2af   :  { %v1094_v34 = vpop.f32.mrb[0].mxu0 }
 0x2b0   :  { %v1095_v35 = vpop.f32.mrb[1].mxu0 }
 0x2b1   :  { %v1096_v36 = vadd.f32 %v1095_v35, %v1094_v34 }
 0x2b3   :  { %v1129_v38 = vpop.f32.mrb[8].mxu1  ;;  %v705_v40 = vadd.f32 %v1096_v36, %v1056_v37 }
 0x2b4   :  { %v1130_v39 = vpop.f32.mrb[9].mxu1 }
 0x2b5   :  { %v1131_v41 = vadd.f32 %v1130_v39, %v1129_v38 }
 0x2b7   :  { %v775_v42 = vadd.f32 %v1131_v41, %v705_v40 }
 0x2cf   :  { %v1164_v43 = vpop.f32.mrb[2].mxu0 }
 0x2d0   :  { %v1165_v44 = vpop.f32.mrb[3].mxu0 }
 0x2d1   :  { %v1166_v45 = vadd.f32 %v1165_v44, %v1164_v43 }
 0x2d3   :  { %v845_v46 = vadd.f32 %v1166_v45, %v775_v42  ;;  %v1199_v47 = vpop.f32.mrb[10].mxu1 }
 0x2d4   :  { %v1200_v48 = vpop.f32.mrb[11].mxu1 }
 0x2d5   :  { %v1201_v49 = vadd.f32 %v1200_v48, %v1199_v47 }
 0x2d7   :  { %v915_v11 = vadd.f32 %v1201_v49, %v845_v46 }
 0x2d9   :  { %1011 = vst [vmem:[#allocation12] sm:$0x3] %v915_v11  ;;  %1252 = vmatmul.mubr.f32.vlgmr.msra.gmra.mrb[4].mxu0 %v915_v11 }
 0x2da   :  { %1545 = shalt.err (!%p1542_p2)
}
 0x2db   :  { %s1546_s24 = scalar_lea.hbm %s1813_s7, 32 }
 0x2dc   :  { %p1547_p3 = scmp.ne.s32.totalorder %s1813_s7, %s1546_s24  ;;  %p1550_p4 = scmp.lt.u32.totalorder %s1546_s24, %s1813_s7 }
 0x2de   :  { %p1552_p5 = pnand %p1550_p4, %p1547_p3 }
 0x2e0   :  { %1555 = shalt.err (!%p1552_p5)
}
 0x2e1   :  { %1022 = dma.vmem_to_hbm [thread:$0]  %s1020_s21, 32, %s1813_s7, [#allocation5]   ;;  %v1057_v50 = vld [vmem:[%s1812_s6] ss:$0 sm:$0xff] }
 0x2e2   :  { %s1601_s10 = smov [#allocation13]  }
 0x2e3   :  { %s1029_s13 = sshll.u32 %s1601_s10, 4  ;;  %s1030_s13 = int_to_ptr.vmem [resolvable:$true] %s1029_s13 }
 0x2e4   :  { %s1556_s14 = scalar_lea.vmem %s1030_s13, 32  ;;  %p1561_p7 = scmp.lt.s32.totalorder %s1030_s13, %s1030_s13 }
 0x2e5   :  { %p1557_p6 = scmp.ne.s32.totalorder %s1030_s13, %s1556_s14  ;;  %p1562_p8 = scmp.lt.s32.totalorder %s1556_s14, %s1556_s14 }
 0x2e7   :  { %p1563_p9 = por %p1562_p8, %p1561_p7 }
 0x2e9   :  { %p1564_p10 = pnand %p1563_p9, %p1557_p6 }
 0x3ac   :  { %v1007_v51 = vpop.f32.mrb[4].mxu0 }
 0x3ad   :  { %v1008_v52 = vadd.f32 %v1057_v50, %v1007_v51  ;;  %v1253_v54 = vpop.f32.mrb[5].mxu0 }
 0x3af   :  { %1012 = vst [vmem:[#allocation13] sm:$0x3] %v1008_v52 }
 0x3b0   :  { %1567 = shalt.err (!%p1564_p10)
}
 0x3b1   :  { %s1568_s16 = scalar_lea.hbm %s1814_s8, 32 }
 0x3b2   :  { %p1569_p11 = scmp.ne.s32.totalorder %s1814_s8, %s1568_s16  ;;  %p1572_p12 = scmp.lt.u32.totalorder %s1568_s16, %s1814_s8 }
 0x3b4   :  { %p1574_p13 = pnand %p1572_p12, %p1569_p11 }
 0x3b6   :  { %1577 = shalt.err (!%p1574_p13)
}
 0x3b7   :  { %1032 = dma.vmem_to_hbm [thread:$0]  %s1030_s13, 32, %s1814_s8, [#allocation14]  }
 0x3b8   :  { %1584 = dma.done.wait [#allocation5], 32  }
 0x3b9   :  { %1585 = vsyncadd [#allocation5], 4294967264 }
 0x3ba   :  { %1586 = dma.done.wait [#allocation14], 32  }
 0x3bb   :  { %1587 = vsyncadd [#allocation14], 4294967264 }
 0x3bc   :  { %1039 = vsyncpa [#allocation4], 1 }
 0x3bd   :  { %1040 = vsyncpa [#allocation7], 1 }
 0x3be   :  { %1041 = vsyncpa [#allocation10], 1 }
 0x3bf   :  { %1042 = vsyncpa [#allocation5], 1 }
 0x3c0   :  { %1043 = vsyncpa [#allocation14], 1 }

</bundles_post_ra>
